<compile_context>
chip_gen: v5e
topology: v5e:2x2
jax: 0.10.0
libtpu: 0.0.40
codegen_flags: <defaults>
</compile_context>

<pallas_src>
import functools

import jax
import jax.numpy as jnp
from jax.experimental import pallas as pl
from jax.experimental.pallas import tpu as pltpu

_LANE = 128


def _round_up(v: int, m: int) -> int:
    return ((v + m - 1) // m) * m


def _tpu_caps():
    """(physical VMEM bytes per core, #TensorCores) with safe fallbacks."""
    vmem_bytes = 128 * 1024 * 1024
    num_cores = 1
    try:
        info = pltpu.get_tpu_info()
        vmem_bytes = int(getattr(info, "vmem_capacity_bytes", vmem_bytes))
        for attr in ("num_tensorcores", "tensorcore_count", "num_cores", "core_count"):
            val = getattr(info, attr, None)
            if val:
                num_cores = int(val)
                break
    except Exception:
        pass
    # Heuristic: the small-VMEM generation (<= 64 MiB per TC, i.e. v7x) is the
    # multi-TensorCore one; 128 MiB parts (v5e/v6e) have a single TC.
    if num_cores == 1 and vmem_bytes <= 64 * 1024 * 1024:
        num_cores = 2
    return vmem_bytes, num_cores


def _layernorm2d_kernel(x_ref, w_ref, b_ref, o_ref, *, eps: float):
    # x_ref: (C, T)   w_ref/b_ref: (C, 1)   o_ref: (C, T)
    x = x_ref[...].astype(jnp.float32)
    mu = jnp.mean(x, axis=0, keepdims=True)                 # (1, T) over channels
    mean_sq = jnp.mean(x * x, axis=0, keepdims=True)        # single sweep over x
    var = jnp.maximum(mean_sq - mu * mu, 0.0)               # biased variance
    inv = jax.lax.rsqrt(var + eps)
    w = w_ref[...].astype(jnp.float32)                      # (C, 1) broadcast over lanes
    b = b_ref[...].astype(jnp.float32)
    o_ref[...] = ((x - mu) * inv * w + b).astype(o_ref.dtype)


def _pick_tile(hw: int, c: int, dtype, n_batch: int,
               budget_bytes: int, max_tile: int, num_cores: int):
    """Lane tile (multiple of 128 dividing the padded extent) + padded extent."""
    itemsize = jnp.dtype(dtype).itemsize
    # Sublane packing: f32 tiles are (8,128), bf16 (16,128), int8 (32,128).
    pack = 8 * max(1, 4 // itemsize)
    c_io = _round_up(c, pack)          # padded channel rows for the I/O blocks
    c_f32 = _round_up(c, 8)            # padded channel rows for f32 temporaries
    # Per lane-column bytes: double-buffered in + out blocks, ~2 live f32 temps.
    per_lane_col = c_io * (2 * 2 * itemsize) + c_f32 * (2 * 4)
    cap_lanes = max(_LANE, (budget_bytes // max(per_lane_col, 1)) // _LANE * _LANE)
    cap_lanes = min(cap_lanes, max_tile)

    hwp = _round_up(hw, _LANE)
    m = hwp // _LANE                   # number of 128-lane groups
    d_cap = max(1, min(m, cap_lanes // _LANE))

    # On multi-TensorCore chips keep enough total grid steps (~4 per core) so
    # megacore sharding and the BlockSpec double-buffering have work to overlap.
    if num_cores > 1:
        desired_spatial_steps = -(-4 * num_cores // max(n_batch, 1))   # ceil div
        if m >= desired_spatial_steps:
            d_cap = min(d_cap, max(1, m // desired_spatial_steps))

    # Largest divisor of m that is <= d_cap: the tile divides hwp exactly, so
    # there is no ragged last block (d_cap is tiny, so this loop is trivial).
    d = 1
    for cand in range(d_cap, 0, -1):
        if m % cand == 0:
            d = cand
            break
    return d * _LANE, hwp


def layernorm2d(x: jax.Array, weight: jax.Array, bias: jax.Array,
                eps: float = 1e-6) -> jax.Array:
    """x: (N, C, H, W), weight/bias: (C,). Returns (N, C, H, W)."""
    N, C, H, W = x.shape
    HW = H * W
    x2 = x.reshape(N, C, HW)
    w2 = weight.reshape(C, 1)
    b2 = bias.reshape(C, 1)

    vmem_bytes, num_cores = _tpu_caps()
    vmem_limit = min(64 * 1024 * 1024, int(vmem_bytes * 0.80))
    budget = int(vmem_limit * 0.35)
    max_tile = 4096 if vmem_bytes >= 96 * 1024 * 1024 else 2048

    tile, HWp = _pick_tile(HW, C, x.dtype, N, budget, max_tile, num_cores)

    if HWp != HW:
        # Only pad up to the next 128-lane boundary (never up to the tile).
        # Normalization is per spatial column (over channels), so zero-padded
        # columns are independent, finite (output = bias) and dropped below.
        x2 = jnp.pad(x2, ((0, 0), (0, 0), (0, HWp - HW)))

    grid = (N, HWp // tile)
    kernel = functools.partial(_layernorm2d_kernel, eps=eps)

    out2 = pl.pallas_call(
        kernel,
        out_shape=jax.ShapeDtypeStruct((N, C, HWp), x.dtype),
        grid_spec=pltpu.PrefetchScalarGridSpec(
            num_scalar_prefetch=0,
            grid=grid,
            in_specs=[
                pl.BlockSpec((pl.Squeezed(), C, tile), lambda n, j: (n, 0, j)),
                pl.BlockSpec((C, 1), lambda n, j: (0, 0)),
                pl.BlockSpec((C, 1), lambda n, j: (0, 0)),
            ],
            out_specs=pl.BlockSpec((pl.Squeezed(), C, tile), lambda n, j: (n, 0, j)),
        ),
        compiler_params=pltpu.CompilerParams(
            dimension_semantics=("parallel", "parallel"),
            vmem_limit_bytes=vmem_limit),
    )(x2, w2, b2)

    if HWp != HW:
        out2 = out2[:, :, :HW]
    return out2.reshape(N, C, H, W)


def _reference(x, weight, bias, eps=1e-6):
    mu = jnp.mean(x, axis=1, keepdims=True)
    var = jnp.mean((x - mu) ** 2, axis=1, keepdims=True)
    y = (x - mu) / jnp.sqrt(var + eps)
    return weight.reshape(1, -1, 1, 1) * y + bias.reshape(1, -1, 1, 1)


if __name__ == "__main__":
    key = jax.random.PRNGKey(0)
    kx, kw, kb, kx2 = jax.random.split(key, 4)

    # Case 1: HW a multiple of 128 (no padding path).
    N, C, H, W = 2, 4, 16, 16
    x = jax.random.normal(kx, (N, C, H, W), dtype=jnp.float32)
    weight = jnp.ones((C,), jnp.float32) + 0.1 * jax.random.normal(kw, (C,), jnp.float32)
    bias = 0.1 * jax.random.normal(kb, (C,), jnp.float32)

    out = jax.block_until_ready(layernorm2d(x, weight, bias, eps=1e-6))
    ref = _reference(x, weight, bias, eps=1e-6)
    assert out.shape == (N, C, H, W)
    assert jnp.allclose(out, ref, atol=1e-4, rtol=1e-4), "mismatch vs reference (HW%128==0)"

    # Case 2: HW NOT a multiple of 128 (exercises the pad-to-128 path).
    H2, W2 = 13, 13
    x2 = jax.random.normal(kx2, (N, C, H2, W2), dtype=jnp.float32)
    out2 = jax.block_until_ready(layernorm2d(x2, weight, bias, eps=1e-6))
    ref2 = _reference(x2, weight, bias, eps=1e-6)
    assert out2.shape == (N, C, H2, W2)
    assert jnp.allclose(out2, ref2, atol=1e-4, rtol=1e-4), "mismatch vs reference (padded)"

    print("KERNEL_OK")
</pallas_src>

<mosaic_0001>
module attributes {stable_mosaic.version = 11 : i64} {
  func.func @_layernorm2d_kernel(%arg0: i32, %arg1: i32, %arg2: memref<1x4x256xf32, #tpu.memory_space<vmem>>, %arg3: memref<4x1xf32, #tpu.memory_space<vmem>>, %arg4: memref<4x1xf32, #tpu.memory_space<vmem>>, %arg5: memref<1x4x256xf32, #tpu.memory_space<vmem>>) attributes {dimension_semantics = [#tpu.dimension_semantics<parallel>, #tpu.dimension_semantics<parallel>], iteration_bounds = array<i64: 2, 1>, scalar_prefetch = 0 : i64, scratch_operands = 0 : i64, tpu.core_type = #tpu.core_type<tc>, window_params = [{transform_indices = @transform_0, window_bounds = array<i64: 1, 4, 256>}, {pipeline_mode = #tpu.pipeline_mode<synchronous>, transform_indices = @transform_1, window_bounds = array<i64: 4, 1>}, {pipeline_mode = #tpu.pipeline_mode<synchronous>, transform_indices = @transform_2, window_bounds = array<i64: 4, 1>}, {transform_indices = @transform_3, window_bounds = array<i64: 1, 4, 256>}]} {
    %c0 = arith.constant 0 : index
    %c0_0 = arith.constant 0 : index
    %c0_1 = arith.constant 0 : index
    %0 = vector.load %arg2[%c0, %c0_0, %c0_1] : memref<1x4x256xf32, #tpu.memory_space<vmem>>, vector<1x4x256xf32>
    %1 = vector.shape_cast %0 : vector<1x4x256xf32> to vector<4x256xf32>
    %cst = arith.constant dense<0.000000e+00> : vector<256xf32>
    %2 = vector.multi_reduction <add>, %1, %cst [0] : vector<4x256xf32> to vector<256xf32>
    %3 = vector.shape_cast %2 : vector<256xf32> to vector<1x256xf32>
    %cst_2 = arith.constant 4.000000e+00 : f32
    %4 = vector.broadcast %cst_2 : f32 to vector<1x256xf32>
    %5 = arith.divf %3, %4 : vector<1x256xf32>
    %6 = arith.mulf %1, %1 : vector<4x256xf32>
    %cst_3 = arith.constant dense<0.000000e+00> : vector<256xf32>
    %7 = vector.multi_reduction <add>, %6, %cst_3 [0] : vector<4x256xf32> to vector<256xf32>
    %8 = vector.shape_cast %7 : vector<256xf32> to vector<1x256xf32>
    %cst_4 = arith.constant 4.000000e+00 : f32
    %9 = vector.broadcast %cst_4 : f32 to vector<1x256xf32>
    %10 = arith.divf %8, %9 : vector<1x256xf32>
    %11 = arith.mulf %5, %5 : vector<1x256xf32>
    %12 = arith.subf %10, %11 : vector<1x256xf32>
    %cst_5 = arith.constant 0.000000e+00 : f32
    %13 = vector.broadcast %cst_5 : f32 to vector<1x256xf32>
    %14 = arith.maximumf %12, %13 : vector<1x256xf32>
    %cst_6 = arith.constant 9.99999997E-7 : f32
    %15 = vector.broadcast %cst_6 : f32 to vector<1x256xf32>
    %16 = arith.addf %14, %15 : vector<1x256xf32>
    %17 = math.rsqrt %16 : vector<1x256xf32>
    %c0_7 = arith.constant 0 : index
    %c0_8 = arith.constant 0 : index
    %18 = vector.load %arg3[%c0_7, %c0_8] : memref<4x1xf32, #tpu.memory_space<vmem>>, vector<4x1xf32>
    %c0_9 = arith.constant 0 : index
    %c0_10 = arith.constant 0 : index
    %19 = vector.load %arg4[%c0_9, %c0_10] : memref<4x1xf32, #tpu.memory_space<vmem>>, vector<4x1xf32>
    %20 = vector.broadcast %5 : vector<1x256xf32> to vector<4x256xf32>
    %21 = arith.subf %1, %20 : vector<4x256xf32>
    %22 = vector.broadcast %17 : vector<1x256xf32> to vector<4x256xf32>
    %23 = arith.mulf %21, %22 : vector<4x256xf32>
    %24 = vector.broadcast %18 : vector<4x1xf32> to vector<4x256xf32>
    %25 = arith.mulf %23, %24 : vector<4x256xf32>
    %26 = vector.broadcast %19 : vector<4x1xf32> to vector<4x256xf32>
    %27 = arith.addf %25, %26 : vector<4x256xf32>
    %c0_11 = arith.constant 0 : index
    %c0_12 = arith.constant 0 : index
    %c0_13 = arith.constant 0 : index
    %28 = vector.load %arg5[%c0_11, %c0_12, %c0_13] : memref<1x4x256xf32, #tpu.memory_space<vmem>>, vector<1x4x256xf32>
    %29 = vector.shape_cast %28 : vector<1x4x256xf32> to vector<4x256xf32>
    %30 = vector.shape_cast %27 : vector<4x256xf32> to vector<1x4x256xf32>
    tpu.vector_store %arg5[%c0_11, %c0_12, %c0_13], %30 {strides = array<i32>} : memref<1x4x256xf32, #tpu.memory_space<vmem>>, vector<1x4x256xf32>,
    return
  }
  func.func @transform_0(%arg0: i32, %arg1: i32) -> (i32, i32, i32) {
    %c0_i32 = arith.constant 0 : i32
    %c0_i32_0 = arith.constant 0 : i32
    return %arg0, %c0_i32, %arg1 : i32, i32, i32
  }
  func.func @transform_1(%arg0: i32, %arg1: i32) -> (i32, i32) {
    %c0_i32 = arith.constant 0 : i32
    %c0_i32_0 = arith.constant 0 : i32
    %c0_i32_1 = arith.constant 0 : i32
    return %c0_i32, %c0_i32_0 : i32, i32
  }
  func.func @transform_2(%arg0: i32, %arg1: i32) -> (i32, i32) {
    %c0_i32 = arith.constant 0 : i32
    %c0_i32_0 = arith.constant 0 : i32
    %c0_i32_1 = arith.constant 0 : i32
    return %c0_i32, %c0_i32_0 : i32, i32
  }
  func.func @transform_3(%arg0: i32, %arg1: i32) -> (i32, i32, i32) {
    %c0_i32 = arith.constant 0 : i32
    %c0_i32_0 = arith.constant 0 : i32
    return %arg0, %c0_i32, %arg1 : i32, i32, i32
  }
}

</mosaic_0001>

<bundles_post_ra>
// kernel: tpu_custom_call.1
= control target key start
LH: loop header
LB: loop body
LE: loop exit
PB: predicated region body
PF: predicated region fallthrough
CT: control target
= control target key end

     0   :  { %8 = vsyncpa [#allocation3], 0  ;;  %s797_s0 = inlined_call_operand.hbm [shape: f32[2,4,256], index: 0, kind: input, shape index: {}]   ;;  %s798_s1 = inlined_call_operand.vmem [shape: f32[4,1], index: 1, kind: input, shape index: {}]   ;;  %s799_s2 = inlined_call_operand.vmem [shape: f32[4,1], index: 2, kind: input, shape index: {}]   ;;  %s800_s3 = inlined_call_operand.hbm [shape: f32[2,4,256], index: 3, kind: output, shape index: {}]  }
   0x1   :  { %10 = vsyncpa [#allocation3 + $0x1], 0 }
   0x2   :  { %11 = vsyncpa [#allocation4], 0 }
   0x3   :  { %13 = vsyncpa [#allocation4 + $0x1], 0  ;;  %s655_s12 = smov 0   ;;  %s657_s13 = smov 0  }
   0x4   :  { %s659_s14 = smov 0   ;;  %s661_s15 = smov 0  }
   0x5   :  { %s663_s16 = smov 0   ;;  %s665_s17 = smov 0  }
   0x6 LB: > { %s429_s18 = sadd.s32 4294967295, %s630_s17   ;;  %s430_s19 = sadd.s32 4294967294, %s630_s17   ;;  %s630_s17 = sphi %s665_s17, %s19_s17   ;;  %s626_s16 = sphi %s663_s16, %s809_s16   ;;  %s622_s15 = sphi %s661_s15, %s808_s15   ;;  %s618_s14 = sphi %s659_s14, %s807_s14   ;;  %s614_s13 = sphi %s657_s13, %s806_s13   ;;  %s610_s12 = sphi %s655_s12, %s805_s12  }
   0x7   : > { %s31_s20 = sadd.s32 1, %s626_s16  ;;  %s40_s21 = sadd.s32 1, %s618_s14 }
   0x8   : > { %p33_p0 = scmp.ge.s32.totalorder %s31_s20, 2  ;;  %p47_p1 = scmp.ne.s32.totalorder %s618_s14, %s614_s13 }
   0x9   : > { %p48_p2 = scmp.eq.s32.totalorder %s630_s17, 0  ;;  %p53_p3 = scmp.ne.s32.totalorder %s614_s13, %s610_s12 }
   0xa   : > { %s811_s20 = smov (%p33_p0, %s31_s20), 0  ;;  %p54_p5 = scmp.eq.s32.totalorder %s429_s18, 0 }
   0xb   : > { %p696_p4 = por %p48_p2, %p47_p1  ;;  %s35_s23 = ssub.s32 %s626_s16, %s811_s20 }
   0xc   : > { %p121_p6 = scmp.eq.s32.totalorder %s429_s18, 1  ;;  %p38_p7 = scmp.eq.s32.totalorder %s35_s23, 0 }
   0xd   : > { %p702_p8 = por %p54_p5, %p53_p3  ;;  %p127_p10 = scmp.eq.s32.totalorder %s430_s19, 1 }
   0xe   : > { %p706_p9 = por %p121_p6, %p47_p1  ;;  %p432_p12 = scmp.ge.s32.totalorder %s630_s17, 2 }
   0xf   : > { %s711_s26 = scalar_select %p38_p7, %s618_s14, %s40_s21  }
  0x10   : > { %p713_p11 = por %p127_p10, %p53_p3  ;;  %p458_p13 = scmp.lt.s32.totalorder %s630_s17, 2 }
  0x11   : > { %s153_s28 = sand.u32 1, %s618_s14   ;;  %s444_s30 = sshll.u32 %s626_s16, 3 }
  0x12   : > { %s433_s29 = sshll.u32 %s153_s28, 3  ;;  %s164_s6 = scalar_lea.hbm %s797_s0, %s444_s30 }
  0x13   : > { %s157_s7 = scalar_lea.vmem [#allocation2], %s433_s29  ;;  %s166_s9 = sshll.u32 %s164_s6, 4  ;;  %s167_s9 = int_to_ptr.hbm [resolvable:$true] %s166_s9 }
  0x14   : > { %s168_s8 = sshll.u32 %s157_s7, 4  ;;  %p451_p0 = pnand %p458_p13, %p696_p4  ;;  %s169_s8 = int_to_ptr.vmem [resolvable:$true] %s168_s8 }
  0x15   : > { %p436_p1 = scmp.ge.s32.totalorder %s630_s17, 1  ;;  %p173_p2 = scmp.lt.s32.totalorder %s630_s17, 3 }
  0x16   : > { %s154_s10 = scalar_lea.sflag [#allocation3], %s153_s28 }
  0x17   : > { %453 = dma.hbm_to_vmem [thread:$0]  (!%p451_p0), %s167_s9, 128, %s169_s8, %s154_s10  }
  0x18   : > { %p174_p3 = pnand %p436_p1, %p173_p2 }
  0x19   : > { %s729_s11 = sand.u32 (!%p174_p3), 1, %s614_s13  }
  0x1a   : > { %177 = sbr.rel (%p174_p3) target bundleno = 164 (0xa4), region = 32  ;;  %s437_s18 = sshll.u32 (!%p174_p3), %s729_s11, 3 }
  0x1b   : > { %s180_s19 = scalar_lea.sflag (!%p174_p3), [#allocation3], %s729_s11  ;;  %s183_s21 = scalar_lea.vmem (!%p174_p3), [#allocation2], %s437_s18 }
  0x1f   : > { %601 = dma.done.wait (%p702_p8), %s180_s19, 128  }
  0x20   : > { %603 = vsyncadd (%p702_p8), %s180_s19, 4294967168  ;;  %v632_v0 = vmov 0   ;;  %v291_v1 = vld [vmem:[%s798_s1] sm:$0xf]  ;;  %v745_v3 = vld [vmem:[%s183_s21] sm:$0xff]  ;;  %v633_v5 = vmov 4.0  }
  0x21   : > { %511 = vset.pattern.permute.xlu0 %v632_v0  ;;  %v292_v2 = vld [vmem:[%s799_s2] sm:$0xf]  ;;  %211 = vst [vmem:[#allocation1] ss:$2 sm:$0xff] %v745_v3  ;;  %v240_v4 = vmul.f32 %v745_v3, %v745_v3  ;;  %512 = vrcp.f32 %v633_v5  ;;  %vm216_vm0 = vcmask 1043456   ;;  %s445_s24 = sshll.u32 %s622_s15, 3 }
  0x22   : > { %307 = vperm.xlu0 %511, %v291_v1   ;;  %s340_s5 = scalar_lea.hbm %s800_s3, %s445_s24  ;;  %s206_s6 = scalar_lea.vmem [#allocation5], %s437_s18 }
  0x23   : > { %s342_s7 = sshll.u32 %s206_s6, 4  ;;  %s344_s8 = sshll.u32 %s340_s5, 4  ;;  %s343_s7 = int_to_ptr.vmem [resolvable:$true] %s342_s7  ;;  %s345_s8 = int_to_ptr.hbm [resolvable:$true] %s344_s8 }
  0x24   : > { %s327_s9 = scalar_lea.sflag [#allocation4], %s729_s11  ;;  %s562_s15 = sshra.s32 %s345_s8, 4  ;;  %s563_s15 = int_to_ptr.hbm [resolvable:$true] %s562_s15 }
  0x25   : > { %s564_s10 = scalar_lea.hbm %s563_s15, 8  ;;  %s568_s18 = scalar_lea.hbm %s800_s3, 16 }
  0x26   : > { %p565_p4 = scmp.ne.s32.totalorder %s563_s15, %s564_s10  ;;  %p569_p7 = scmp.lt.s32.totalorder %s563_s15, %s800_s3 }
  0x27   : > { %v513_v8 = vpop.eup %512  ;;  %p570_p8 = scmp.lt.s32.totalorder %s568_s18, %s564_s10 }
  0x28   : > { %v212_v6 = vld.sshfl [vmem:[#allocation1] sm:$0xff pattern:$0x75316420]  ;;  %v213_v7 = vld.sshfl [vmem:[#allocation1 + $0x8] sm:$0xff pattern:$0x75316420]  ;;  %vm236_vm1 = vweird.f32 %v513_v8  ;;  %p566_p5 = pnand %p565_p4, %p706_p9 }
  0x29   : > { %242 = vst [vmem:[#allocation1] ss:$2 sm:$0xff] %v240_v4  ;;  %v224_v9 = vsel %vm216_vm0, %v213_v7, 0.0  ;;  %v232_v12 = vmul.f32 4.0, %v513_v8  ;;  %v217_v13 = vsel %vm216_vm0, %v212_v6, 0.0  ;;  %p571_p10 = por %p570_p8, %p569_p7 }
  0x2a   : > { %317 = vperm.xlu0 %511, %v292_v2   ;;  %v225_v10 = vrot.slane %v224_v9, 4  ;;  %v218_v15 = vrot.slane %v217_v13, 4  ;;  %v634_v7 = vmov 839922192   ;;  %p567_p6 = pneg %p566_p5 }
  0x2b   : > { %v233_v24 = vsub.f32 1.0, %v232_v12 }
  0x2c   : > { %v226_v16 = vadd.f32 %v225_v10, %v224_v9  ;;  %v219_v20 = vadd.f32 %v218_v15, %v217_v13  ;;  %p572_p13 = pnand %p571_p10, %p567_p6 }
  0x2d   : > { %v234_v29 = vmul.f32 %v513_v8, %v233_v24 }
  0x2e   : > { %v227_v21 = vrot.slane %v226_v16, 2  ;;  %v220_v25 = vrot.slane %v219_v20, 2 }
  0x2f   : > { %v235_v34 = vadd.f32 %v513_v8, %v234_v29 }
  0x30   : > { %v244_v11 = vld.sshfl [vmem:[#allocation1 + $0x8] sm:$0xff pattern:$0x75316420]  ;;  %v243_v17 = vld.sshfl [vmem:[#allocation1] sm:$0xff pattern:$0x75316420]  ;;  %v228_v26 = vadd.f32 %v227_v21, %v226_v16  ;;  %v221_v30 = vadd.f32 %v220_v25, %v219_v20 }
  0x31   : > { %v254_v14 = vsel %vm216_vm0, %v244_v11, 0.0  ;;  %v247_v19 = vsel %vm216_vm0, %v243_v17, 0.0  ;;  %v237_v39 = vsel %vm236_vm1, %v513_v8, %v235_v34  ;;  %v310_v8 = vunpack.c.l.s4 %v634_v7 }
  0x32   : > { %v255_v18 = vrot.slane %v254_v14, 4  ;;  %v248_v22 = vrot.slane %v247_v19, 4  ;;  %v229_v31 = vrot.slane %v228_v26, 1  ;;  %v222_v35 = vrot.slane %v221_v30, 1 }
  0x33   : > { %v311_v13 = vunpack.c.0.s8 %v310_v8 }
  0x34   : > { %v256_v23 = vadd.f32 %v255_v18, %v254_v14  ;;  %v249_v27 = vadd.f32 %v248_v22, %v247_v19  ;;  %v230_v36 = vadd.f32 %v229_v31, %v228_v26  ;;  %v223_v40 = vadd.f32 %v222_v35, %v221_v30 }
  0x36   : > { %v257_v28 = vrot.slane %v256_v23, 2  ;;  %v250_v32 = vrot.slane %v249_v27, 2  ;;  %v239_v41 = vmul.f32 %v237_v39, %v230_v36  ;;  %v238_v44 = vmul.f32 %v237_v39, %v223_v40 }
  0x38   : > { %v258_v33 = vadd.f32 %v257_v28, %v256_v23  ;;  %v251_v37 = vadd.f32 %v250_v32, %v249_v27  ;;  %v264_v47 = vmul.f32 %v239_v41, %v239_v41  ;;  %v263_v49 = vmul.f32 %v238_v44, %v238_v44 }
  0x39   : > { %v295_v4 = vrot.slane %v239_v41, 4 }
  0x3a   : > { %v259_v38 = vrot.slane %v258_v33, 1  ;;  %v252_v42 = vrot.slane %v251_v37, 1 }
  0x3b   : > { %v296_v9 = vsel %vm216_vm0, %v238_v44, %v295_v4 }
  0x3c   : > { %v260_v43 = vadd.f32 %v259_v38, %v258_v33  ;;  %v253_v45 = vadd.f32 %v252_v42, %v251_v37  ;;  %v298_v14 = vsub.f32 %v745_v3, %v296_v9 }
  0x3e   : > { %v262_v46 = vmul.f32 %v260_v43, %v237_v39  ;;  %v261_v48 = vmul.f32 %v253_v45, %v237_v39 }
  0x40   : > { %v266_v50 = vsub.f32 %v262_v46, %v264_v47  ;;  %v265_v51 = vsub.f32 %v261_v48, %v263_v49 }
  0x42   : > { %v268_v52 = vmax.f32 %v266_v50, 0.0  ;;  %v267_v53 = vmax.f32 %v265_v51, 0.0 }
  0x44   : > { %v270_v54 = vadd.f32 1e-06, %v268_v52  ;;  %v269_v55 = vadd.f32 1e-06, %v267_v53 }
  0x46   : > { %514 = vrsqrt.f32 %v270_v54  ;;  %vm287_vm2 = vweird.f32 %v270_v54  ;;  %vm277_vm5 = vweird.f32 %v269_v55 }
  0x47   : > { %516 = vrsqrt.f32 %v269_v55 }
  0x4c   : > { %v515_v56 = vpop.eup %514 }
  0x4d   : > { %v282_v57 = vmul.f32 %v515_v56, %v270_v54  ;;  %v517_v58 = vpop.eup %516  ;;  %vm288_vm3 = vweird.f32 %v515_v56 }
  0x4e   : > { %v272_v59 = vmul.f32 %v517_v58, %v269_v55  ;;  %vm289_vm4 = vmor %vm287_vm2, %vm288_vm3  ;;  %vm278_vm6 = vweird.f32 %v517_v58 }
  0x4f   : > { %v283_v60 = vmul.f32 %v515_v56, %v282_v57  ;;  %vm279_vm7 = vmor %vm277_vm5, %vm278_vm6 }
  0x50   : > { %v273_v61 = vmul.f32 %v517_v58, %v272_v59 }
  0x51   : > { %v284_v62 = vmul.f32 0.5, %v283_v60 }
  0x52   : > { %v274_v63 = vmul.f32 0.5, %v273_v61 }
  0x53   : > { %v285_v0 = vsub.f32 1.5, %v284_v62 }
  0x54   : > { %v275_v1 = vsub.f32 1.5, %v274_v63 }
  0x55   : > { %v286_v2 = vmul.f32 %v515_v56, %v285_v0 }
  0x56   : > { %v276_v5 = vmul.f32 %v517_v58, %v275_v1 }
  0x57   : > { %v290_v6 = vsel %vm289_vm4, %v515_v56, %v286_v2 }
  0x58   : > { %v301_v10 = vrot.slane %v290_v6, 4  ;;  %v280_v11 = vsel %vm279_vm7, %v517_v58, %v276_v5 }
  0x5a   : > { %v302_v15 = vsel %vm216_vm0, %v280_v11, %v301_v10 }
  0x5b   : > { %v304_v16 = vmul.f32 %v302_v15, %v298_v14 }
  0x94   : > { %v308_v12 = vpop.permute.xlu0 %307 }
  0x95   : > { %v312_v17 = vperm.slane %v308_v12, %v311_v13 }
  0x97   : > { %v314_v19 = vmul.f32 %v312_v17, %v304_v16 }
  0x9c   : > { %v318_v18 = vpop.permute.xlu0 %317 }
  0x9d   : > { %v322_v20 = vperm.slane %v318_v18, %v311_v13 }
  0x9f   : > { %v324_v21 = vadd.f32 %v322_v20, %v314_v19 }
  0xa1   : > { %325 = vst [vmem:[%s206_s6] sm:$0xff] %v324_v21 }
  0xa2   : > { %575 = shalt.err (!%p572_p13)
}
  0xa3   : > { %448 = dma.vmem_to_hbm [thread:$0]  (%p706_p9), %s343_s7, 128, %s345_s8, %s327_s9  }
  0xa4 PF: > { %s356_s11 = sand.u32 1, %s610_s12   ;;  %p455_p0 = pnand %p432_p12, %p713_p11 }
  0xa5   : > { %s357_s28 = scalar_lea.sflag [#allocation4], %s356_s11 }
  0xa6   : > { %p456_p1 = pneg %p455_p0 }
  0xa8   : > { %605 = dma.done.wait (%p456_p1), %s357_s28, 128  }
  0xa9   : > { %607 = vsyncadd (%p456_p1), %s357_s28, 4294967168  ;;  %s19_s17 = sadd.s32 1, %s630_s17   ;;  %s805_s12 = smov %s614_s13 }
  0xaa   : > { %p16_p2 = scmp.ge.s32.totalorder %s19_s17, 4   ;;  %s806_s13 = smov %s618_s14 }
  0xab   : > { %s807_s14 = smov %s711_s26  ;;  %s808_s15 = smov %s626_s16 }
  0xac   : > { %s809_s16 = smov %s811_s20  ;;  %18 = sbr.rel (!%p16_p2) target bundleno = 6 (0x6), region = 77 }
  0xb1   :  { %363 = vsyncpa [#allocation3], 1 }
  0xb2   :  { %365 = vsyncpa [#allocation3 + $0x1], 1 }
  0xb3   :  { %366 = vsyncpa [#allocation4], 1 }
  0xb4   :  { %368 = vsyncpa [#allocation4 + $0x1], 1 }

</bundles_post_ra>
